<compile_context>
chip_gen: v7x
topology: tpu7x:2x2x1
jax: 0.10.0
libtpu: 0.0.40
codegen_flags: <defaults>
</compile_context>

<pallas_src>
import functools

import jax
import jax.numpy as jnp
from jax import lax
from jax.experimental import pallas as pl
from jax.experimental.pallas import tpu as pltpu


# ----------------------------------------------------------------------------
# Kernel: LayerNorm over the last dim of a (TM, E) row tile.
# ----------------------------------------------------------------------------
def _layernorm_kernel(x_ref, scale_ref, shift_ref, o_ref, *, eps):
    x = x_ref[...].astype(jnp.float32)                    # (TM, E)
    e = x.shape[-1]
    inv_e = jnp.float32(1.0 / e)

    # One-pass statistics: E[x] and E[x^2]  (single pair of XLU reductions).
    s1 = jnp.sum(x, axis=-1, keepdims=True)
    s2 = jnp.sum(x * x, axis=-1, keepdims=True)
    mean = s1 * inv_e
    var = s2 * inv_e - mean * mean                        # unbiased=False

    inv_std = lax.rsqrt(var + jnp.float32(eps))           # EUP rsqrt
    y = (x - mean) * inv_std                              # centered once
    y = y * scale_ref[...].astype(jnp.float32) + shift_ref[...].astype(jnp.float32)
    o_ref[...] = y.astype(o_ref.dtype)


# ----------------------------------------------------------------------------
# Wrapper: tile the row dimension, keep scale/shift resident.
# ----------------------------------------------------------------------------
def layernorm(x, scale, shift, *, eps=1e-5, block_rows=256):
    orig_shape = x.shape
    e = orig_shape[-1]
    x2 = x.reshape(-1, e)                                 # (N, E)
    n = x2.shape[0]

    if n <= block_rows:
        tm = n                                            # single full block
        n_pad = 0
    else:
        tm = block_rows                                   # multiple of 8 (f32 sublane)
        n_pad = (-n) % tm
        if n_pad:
            x2 = jnp.pad(x2, ((0, n_pad), (0, 0)))

    n_padded = n + n_pad
    grid = (n_padded // tm,)

    scale2 = scale.reshape(1, e)
    shift2 = shift.reshape(1, e)

    out = pl.pallas_call(
        functools.partial(_layernorm_kernel, eps=eps),
        grid=grid,
        in_specs=[
            pl.BlockSpec((tm, e), lambda i: (i, 0)),      # row tile, pipelined
            pl.BlockSpec((1, e), lambda i: (0, 0)),       # resident scale
            pl.BlockSpec((1, e), lambda i: (0, 0)),       # resident shift
        ],
        out_specs=pl.BlockSpec((tm, e), lambda i: (i, 0)),
        out_shape=jax.ShapeDtypeStruct((n_padded, e), x.dtype),
        compiler_params=pltpu.CompilerParams(
            dimension_semantics=("parallel",),
        ),
    )(x2, scale2, shift2)

    if n_pad:
        out = out[:n]
    return out.reshape(orig_shape)


# ----------------------------------------------------------------------------
# Pure-JAX reference (mirrors the PyTorch module exactly).
# ----------------------------------------------------------------------------
def layernorm_ref(x, scale, shift, eps=1e-5):
    xf = x.astype(jnp.float32)
    mean = jnp.mean(xf, axis=-1, keepdims=True)
    var = jnp.mean((xf - mean) ** 2, axis=-1, keepdims=True)   # unbiased=False
    norm = (xf - mean) / jnp.sqrt(var + eps)
    return (scale * norm + shift).astype(x.dtype)


if __name__ == "__main__":
    # Small shapes implied by the module: (batch=2, seq=8, emb_dim=128).
    # E = 128 keeps the lane axis dense (unmasked vector stores).
    B, T, E = 2, 8, 128

    key = jax.random.PRNGKey(0)
    k_x, k_s, k_b = jax.random.split(key, 3)

    x = jax.random.normal(k_x, (B, T, E), dtype=jnp.float32)
    # Module initializes scale=1, shift=0; use perturbed values so the affine
    # path is actually exercised (forward semantics are identical).
    scale = 1.0 + 0.1 * jax.random.normal(k_s, (E,), dtype=jnp.float32)
    shift = 0.1 * jax.random.normal(k_b, (E,), dtype=jnp.float32)

    out = layernorm(x, scale, shift)
    out = jax.block_until_ready(out)

    ref = layernorm_ref(x, scale, shift)

    assert out.shape == (B, T, E)
    assert bool(jnp.all(jnp.isfinite(out)))
    assert bool(jnp.allclose(out, ref, atol=1e-5, rtol=1e-5)), (
        f"max abs err = {float(jnp.max(jnp.abs(out - ref)))}"
    )
    print("KERNEL_OK")
</pallas_src>

<mosaic_0001>
module attributes {stable_mosaic.version = 11 : i64} {
  func.func @_layernorm_kernel(%arg0: i32, %arg1: memref<16x128xf32, #tpu.memory_space<vmem>>, %arg2: memref<1x128xf32, #tpu.memory_space<vmem>>, %arg3: memref<1x128xf32, #tpu.memory_space<vmem>>, %arg4: memref<16x128xf32, #tpu.memory_space<vmem>>) attributes {dimension_semantics = [#tpu.dimension_semantics<parallel>], iteration_bounds = array<i64: 1>, scalar_prefetch = 0 : i64, scratch_operands = 0 : i64, tpu.core_type = #tpu.core_type<tc>, window_params = [{transform_indices = @transform_0, window_bounds = array<i64: 16, 128>}, {pipeline_mode = #tpu.pipeline_mode<synchronous>, transform_indices = @transform_1, window_bounds = array<i64: 1, 128>}, {pipeline_mode = #tpu.pipeline_mode<synchronous>, transform_indices = @transform_2, window_bounds = array<i64: 1, 128>}, {transform_indices = @transform_3, window_bounds = array<i64: 16, 128>}]} {
    %c0 = arith.constant 0 : index
    %c0_0 = arith.constant 0 : index
    %0 = vector.load %arg1[%c0, %c0_0] : memref<16x128xf32, #tpu.memory_space<vmem>>, vector<16x128xf32>
    %cst = arith.constant dense<0.000000e+00> : vector<16xf32>
    %1 = vector.multi_reduction <add>, %0, %cst [1] : vector<16x128xf32> to vector<16xf32>
    %2 = vector.shape_cast %1 : vector<16xf32> to vector<16x1xf32>
    %3 = arith.mulf %0, %0 : vector<16x128xf32>
    %cst_1 = arith.constant dense<0.000000e+00> : vector<16xf32>
    %4 = vector.multi_reduction <add>, %3, %cst_1 [1] : vector<16x128xf32> to vector<16xf32>
    %5 = vector.shape_cast %4 : vector<16xf32> to vector<16x1xf32>
    %cst_2 = arith.constant 7.812500e-03 : f32
    %6 = vector.broadcast %cst_2 : f32 to vector<16x1xf32>
    %7 = arith.mulf %2, %6 : vector<16x1xf32>
    %cst_3 = arith.constant 7.812500e-03 : f32
    %8 = vector.broadcast %cst_3 : f32 to vector<16x1xf32>
    %9 = arith.mulf %5, %8 : vector<16x1xf32>
    %10 = arith.mulf %7, %7 : vector<16x1xf32>
    %11 = arith.subf %9, %10 : vector<16x1xf32>
    %cst_4 = arith.constant 9.99999974E-6 : f32
    %12 = vector.broadcast %cst_4 : f32 to vector<16x1xf32>
    %13 = arith.addf %11, %12 : vector<16x1xf32>
    %14 = math.rsqrt %13 : vector<16x1xf32>
    %15 = vector.broadcast %7 : vector<16x1xf32> to vector<16x128xf32>
    %16 = arith.subf %0, %15 : vector<16x128xf32>
    %17 = vector.broadcast %14 : vector<16x1xf32> to vector<16x128xf32>
    %18 = arith.mulf %16, %17 : vector<16x128xf32>
    %c0_5 = arith.constant 0 : index
    %c0_6 = arith.constant 0 : index
    %19 = vector.load %arg2[%c0_5, %c0_6] : memref<1x128xf32, #tpu.memory_space<vmem>>, vector<1x128xf32>
    %20 = vector.broadcast %19 : vector<1x128xf32> to vector<16x128xf32>
    %21 = arith.mulf %18, %20 : vector<16x128xf32>
    %c0_7 = arith.constant 0 : index
    %c0_8 = arith.constant 0 : index
    %22 = vector.load %arg3[%c0_7, %c0_8] : memref<1x128xf32, #tpu.memory_space<vmem>>, vector<1x128xf32>
    %23 = vector.broadcast %22 : vector<1x128xf32> to vector<16x128xf32>
    %24 = arith.addf %21, %23 : vector<16x128xf32>
    %c0_9 = arith.constant 0 : index
    %c0_10 = arith.constant 0 : index
    %25 = vector.load %arg4[%c0_9, %c0_10] : memref<16x128xf32, #tpu.memory_space<vmem>>, vector<16x128xf32>
    tpu.vector_store %arg4[%c0_9, %c0_10], %24 {strides = array<i32>} : memref<16x128xf32, #tpu.memory_space<vmem>>, vector<16x128xf32>,
    return
  }
  func.func @transform_0(%arg0: i32) -> (i32, i32) {
    %c0_i32 = arith.constant 0 : i32
    %c0_i32_0 = arith.constant 0 : i32
    return %arg0, %c0_i32 : i32, i32
  }
  func.func @transform_1(%arg0: i32) -> (i32, i32) {
    %c0_i32 = arith.constant 0 : i32
    %c0_i32_0 = arith.constant 0 : i32
    %c0_i32_1 = arith.constant 0 : i32
    return %c0_i32, %c0_i32_0 : i32, i32
  }
  func.func @transform_2(%arg0: i32) -> (i32, i32) {
    %c0_i32 = arith.constant 0 : i32
    %c0_i32_0 = arith.constant 0 : i32
    %c0_i32_1 = arith.constant 0 : i32
    return %c0_i32, %c0_i32_0 : i32, i32
  }
  func.func @transform_3(%arg0: i32) -> (i32, i32) {
    %c0_i32 = arith.constant 0 : i32
    %c0_i32_0 = arith.constant 0 : i32
    return %arg0, %c0_i32 : i32, i32
  }
}

</mosaic_0001>

<bundles_post_ra>
// kernel: tpu_custom_call.1
= control target key start
LH: loop header
LB: loop body
LE: loop exit
PB: predicated region body
PF: predicated region fallthrough
CT: control target
= control target key end

     0   :  { %8 = vsyncpa [#allocation3], 0  ;;  %s212_s0 = inlined_call_operand.hbm [shape: f32[16,128], index: 0, kind: input, shape index: {}]   ;;  %s213_s1 = inlined_call_operand.vmem [shape: f32[1,128], index: 1, kind: input, shape index: {}]   ;;  %s214_s2 = inlined_call_operand.vmem [shape: f32[1,128], index: 2, kind: input, shape index: {}]   ;;  %s215_s3 = inlined_call_operand.hbm [shape: f32[16,128], index: 3, kind: output, shape index: {}]  }
   0x1   :  { %9 = vsyncpa [#allocation4], 0  ;;  %s152_s12 = smov [#allocation2]   ;;  %s104_s16 = scalar_lea.hbm %s212_s0, 256 }
   0x2   :  { %s15_s13 = sshll.u32 %s152_s12, 4  ;;  %p105_p0 = scmp.ne.s32.totalorder %s212_s0, %s104_s16  ;;  %s16_s13 = int_to_ptr.vmem [resolvable:$true] %s15_s13 }
   0x3   :  { %p108_p1 = scmp.lt.u32.totalorder %s104_s16, %s212_s0 }
   0x5   :  { %p110_p2 = pnand %p108_p1, %p105_p0 }
   0x7   :  { %113 = shalt.err (!%p110_p2)
}
   0x8   :  { %s114_s21 = scalar_lea.vmem %s16_s13, 256  ;;  %p119_p4 = scmp.lt.s32.totalorder %s16_s13, %s16_s13 }
   0x9   :  { %p115_p3 = scmp.ne.s32.totalorder %s16_s13, %s114_s21  ;;  %p120_p5 = scmp.lt.s32.totalorder %s114_s21, %s114_s21 }
   0xb   :  { %p121_p6 = por %p120_p5, %p119_p4 }
   0xd   :  { %p122_p7 = pnand %p121_p6, %p115_p3 }
   0xf   :  { %125 = shalt.err (!%p122_p7)
}
  0x10   :  { %s153_s22 = smov 128   ;;  %s154_s23 = smov 8  }
  0x11   :  { %21 = dma.hbm_to_vmem [thread:$0]  %s212_s0, 256, %s16_s13, [#allocation3], %s153_s22, %s153_s22, %s154_s23  }
  0x12   :  { %148 = dma.done.wait [#allocation3], 256  }
  0x13   :  { %149 = vsyncadd [#allocation3], 4294967040  ;;  %v29_v0 = vld [vmem:[#allocation2] sm:$0xff]  ;;  %v30_v1 = vld [vmem:[#allocation2 + $0x8] sm:$0xff]  ;;  %s155_s29 = smov [#allocation5]  }
  0x14   :  { %31 = vadd.xlane.f32.xlu0 %v29_v0  ;;  %v35_v2 = vmul.f32 %v29_v0, %v29_v0  ;;  %v36_v3 = vmul.f32 %v30_v1, %v30_v1  ;;  %v94_v20 = vld [vmem:[%s213_s1] ss:$0 sm:$0xff]  ;;  %s82_s30 = sshll.u32 %s155_s29, 4  ;;  %s83_s30 = int_to_ptr.vmem [resolvable:$true] %s82_s30 }
  0x15   :  { %v95_v22 = vld [vmem:[%s214_s2] ss:$0 sm:$0xff]  ;;  %s126_s4 = scalar_lea.vmem %s83_s30, 256  ;;  %p131_p9 = scmp.lt.s32.totalorder %s83_s30, %s83_s30 }
  0x16   :  { %37 = vadd.xlane.f32.xlu1 %v35_v2  ;;  %p127_p8 = scmp.ne.s32.totalorder %s83_s30, %s126_s4  ;;  %p132_p10 = scmp.lt.s32.totalorder %s126_s4, %s126_s4 }
  0x18   :  { %33 = vadd.xlane.f32.xlu0 %v30_v1  ;;  %p133_p11 = por %p132_p10, %p131_p9 }
  0x1a   :  { %39 = vadd.xlane.f32.xlu1 %v36_v3  ;;  %p134_p12 = pnand %p133_p11, %p127_p8 }
  0xa1   :  { %v32_v4 = vpop.xlane.xlu0 %31 }
  0xa2   :  { %v41_v5 = vmul.f32 0.0078125, %v32_v4 }
  0xa3   :  { %v38_v6 = vpop.xlane.xlu1 %37 }
  0xa4   :  { %v45_v7 = vmul.f32 %v41_v5, %v41_v5  ;;  %v43_v8 = vmul.f32 0.0078125, %v38_v6  ;;  %v53_v18 = vsub.f32 %v29_v0, %v41_v5 }
  0xa5   :  { %v34_v9 = vpop.xlane.xlu0 %33 }
  0xa6   :  { %v47_v10 = vsub.f32 %v43_v8, %v45_v7  ;;  %v42_v11 = vmul.f32 0.0078125, %v34_v9 }
  0xa7   :  { %v40_v12 = vpop.xlane.xlu1 %39 }
  0xa8   :  { %v49_v13 = vadd.f32 1e-05, %v47_v10  ;;  %v46_v14 = vmul.f32 %v42_v11, %v42_v11  ;;  %v44_v15 = vmul.f32 0.0078125, %v40_v12  ;;  %v54_v23 = vsub.f32 %v30_v1, %v42_v11 }
  0xaa   :  { %100 = vrsqrt.f32 %v49_v13  ;;  %v48_v16 = vsub.f32 %v44_v15, %v46_v14 }
  0xac   :  { %v50_v17 = vadd.f32 1e-05, %v48_v16 }
  0xae   :  { %102 = vrsqrt.f32 %v50_v17 }
  0xb4   :  { %v101_v19 = vpop.eup %100 }
  0xb5   :  { %v55_v21 = vmul.f32 %v101_v19, %v53_v18 }
  0xb7   :  { %v64_v24 = vmul.f32 %v94_v20, %v55_v21 }
  0xb8   :  { %v103_v25 = vpop.eup %102 }
  0xb9   :  { %v56_v26 = vmul.f32 %v103_v25, %v54_v23  ;;  %v73_v27 = vadd.f32 %v95_v22, %v64_v24 }
  0xbb   :  { %v65_v28 = vmul.f32 %v94_v20, %v56_v26  ;;  %75 = vst [vmem:[#allocation5] sm:$0xff] %v73_v27 }
  0xbd   :  { %v74_v29 = vadd.f32 %v95_v22, %v65_v28 }
  0xbf   :  { %76 = vst [vmem:[#allocation5 + $0x8] sm:$0xff] %v74_v29 }
  0xc0   :  { %137 = shalt.err (!%p134_p12)
}
  0xc1   :  { %s138_s5 = scalar_lea.hbm %s215_s3, 256 }
  0xc2   :  { %p139_p13 = scmp.ne.s32.totalorder %s215_s3, %s138_s5  ;;  %p142_p0 = scmp.lt.u32.totalorder %s138_s5, %s215_s3 }
  0xc4   :  { %p144_p1 = pnand %p142_p0, %p139_p13 }
  0xc6   :  { %147 = shalt.err (!%p144_p1)
}
  0xc7   :  { %88 = dma.vmem_to_hbm [thread:$0]  %s83_s30, 256, %s215_s3, [#allocation4], %s153_s22, %s153_s22, %s154_s23  }
  0xc8   :  { %150 = dma.done.wait [#allocation4], 256  }
  0xc9   :  { %151 = vsyncadd [#allocation4], 4294967040 }
  0xca   :  { %92 = vsyncpa [#allocation3], 1 }
  0xcb   :  { %93 = vsyncpa [#allocation4], 1 }

</bundles_post_ra>
